<compile_context>
chip_gen: v5e
topology: v5e:2x2
jax: 0.10.0
libtpu: 0.0.40
codegen_flags: <defaults>
</compile_context>

<pallas_src>
import functools

import jax
import jax.numpy as jnp
from jax.experimental import pallas as pl
from jax.experimental.pallas import tpu as pltpu

_MIB = 1024 * 1024


def _rmsnorm_kernel(x_ref, w_ref, o_ref, *, eps):
    # f32 accumulation for the reduction (accuracy), but do not keep the upcast
    # copy live across it: re-read the native-dtype tile for the final scaling
    # (second read hits the same VMEM input buffer -> no extra HBM traffic).
    xf = x_ref[...].astype(jnp.float32)                    # (TILE_ROWS, d_model)
    mean_sq = jnp.mean(xf * xf, axis=-1, keepdims=True)    # (TILE_ROWS, 1)
    inv_rms = jax.lax.rsqrt(mean_sq + eps)
    # Final scaling in w_ref.dtype (f32, or bf16 on v6e/v7x for bf16 inputs).
    scale = inv_rms.astype(w_ref.dtype)
    o_ref[...] = (x_ref[...].astype(w_ref.dtype) * scale * w_ref[...]).astype(o_ref.dtype)


def _hw_info():
    """Best-effort (vmem_bytes, num_tensorcores, device_kind) query."""
    vmem_bytes = 64 * _MIB          # conservative default == v7x per-TC VMEM
    try:
        info = pltpu.get_tpu_info()
        vmem_bytes = int(getattr(info, "vmem_capacity_bytes", vmem_bytes) or vmem_bytes)
    except Exception:
        pass
    try:
        kind = jax.devices()[0].device_kind.lower()
    except Exception:
        kind = ""
    num_cores = 2 if "v7" in kind else 1
    return vmem_bytes, num_cores, kind


def _choose_tile_rows(rows, d_model, itemsize, vmem_bytes, num_cores):
    # Sublane packing: f32 -> 8 rows, bf16 -> 16, int8/fp8 -> 32.
    sublane = max(8, 32 // itemsize)
    row_bytes = d_model * itemsize
    # Byte-budgeted per-buffer tile: bigger on 128 MiB parts (v5e/v6e).
    target_bytes = 8 * _MIB if vmem_bytes >= 96 * _MIB else 4 * _MIB
    if sublane * row_bytes > target_bytes:
        # Even a minimum-height tile blows the budget (extreme d_model):
        # signal fallback to XLA rather than compile-time VMEM OOM.
        return None
    tr = max(sublane, (target_bytes // row_bytes) // sublane * sublane)
    tr = min(tr, pl.cdiv(rows, sublane) * sublane)          # no bigger than the data
    # Core-aware grid-length rule: shrinking only buys anything with >1 TC.
    min_steps = 2 * num_cores if num_cores > 1 else 1
    while tr > sublane and pl.cdiv(rows, tr) < min_steps:
        tr = max(sublane, (tr // 2) // sublane * sublane)
    return tr


def _rmsnorm_xla(x, weight, eps):
    xf = x.astype(jnp.float32)
    inv_rms = jax.lax.rsqrt(jnp.mean(xf * xf, axis=-1, keepdims=True) + eps)
    return (xf * inv_rms * weight.astype(jnp.float32)).astype(x.dtype)


def rmsnorm(x, weight, eps=1e-6, tile_rows=None):
    """RMSNorm over the last axis of x, scaled by `weight` (shape (d_model,))."""
    orig_shape = x.shape
    d_model = orig_shape[-1]
    rows = 1
    for s in orig_shape[:-1]:
        rows *= s

    # Non-lane-aligned feature dims would hit masked vst.msk slow paths; such
    # shapes are tiny, so plain JAX handles them.
    if d_model % 128 != 0 or rows == 0:
        return _rmsnorm_xla(x, weight, eps)

    vmem_bytes, num_cores, kind = _hw_info()
    itemsize = jnp.dtype(x.dtype).itemsize
    if tile_rows is None:
        tile_rows = _choose_tile_rows(rows, d_model, itemsize, vmem_bytes, num_cores)
    if tile_rows is None:
        return _rmsnorm_xla(x, weight, eps)     # extreme-d_model guard

    x2d = x.reshape(rows, d_model)

    # Final-scale dtype: packed bf16 VALU for bf16 inputs on v6e/v7x (keeps the
    # kernel HBM-bound on v7x); v5e has no bf16 VPU -> keep f32 there.
    if x.dtype == jnp.bfloat16 and "v5" not in kind:
        scale_dtype = jnp.bfloat16
    else:
        scale_dtype = jnp.float32
    # Cast weight once, outside the kernel (avoids per-grid-step astype).
    w2d = weight.astype(scale_dtype).reshape(1, d_model)

    # Ragged grid: Pallas masks the stores of the partial last block, so no
    # jnp.pad copy of x / output slice is needed.
    grid = (pl.cdiv(rows, tile_rows),)

    # VMEM accounting: 2x double-buffered input + 2x double-buffered output,
    # plus the f32 upcast working set for sub-32-bit inputs, plus ~4 MiB Mosaic
    # internal scratch / weight; capped below physical per-core VMEM.
    tile_bytes = tile_rows * d_model * itemsize
    f32_extra = 2 * tile_rows * d_model * 4 if itemsize < 4 else 0
    vmem_needed = 4 * tile_bytes + f32_extra + 4 * _MIB
    vmem_limit = int(min(vmem_bytes - 8 * _MIB, max(32 * _MIB, vmem_needed)))

    out2d = pl.pallas_call(
        functools.partial(_rmsnorm_kernel, eps=eps),
        out_shape=jax.ShapeDtypeStruct((rows, d_model), x.dtype),
        grid_spec=pltpu.PrefetchScalarGridSpec(
            num_scalar_prefetch=0,
            grid=grid,
            in_specs=[
                pl.BlockSpec((tile_rows, d_model), lambda i: (i, 0)),
                pl.BlockSpec((1, d_model), lambda i: (0, 0)),   # weight fetched once
            ],
            out_specs=pl.BlockSpec((tile_rows, d_model), lambda i: (i, 0)),
        ),
        compiler_params=pltpu.CompilerParams(
            dimension_semantics=("parallel",),
            vmem_limit_bytes=vmem_limit,
        ),
    )(x2d, w2d)

    return out2d.reshape(orig_shape)


if __name__ == "__main__":
    key = jax.random.PRNGKey(0)
    k1, k2, k3, k4 = jax.random.split(key, 4)

    # Fast path: lane-dense d_model (multiple of 128) with a ragged row count.
    batch, seq, d_model = 2, 13, 128
    x = jax.random.normal(k1, (batch, seq, d_model), dtype=jnp.float32)
    weight = jnp.ones((d_model,), dtype=jnp.float32)   # nn.Parameter(torch.ones(d_model))

    out = jax.block_until_ready(rmsnorm(x, weight, eps=1e-6))
    rms = jnp.sqrt(jnp.mean(x * x, axis=-1, keepdims=True) + 1e-6)
    ref = x / rms * weight
    assert out.shape == x.shape and out.dtype == x.dtype
    assert jnp.max(jnp.abs(out - ref)) < 1e-5

    # Non-trivial weight to exercise the scale path through the kernel.
    w_rand = jax.random.normal(k2, (d_model,), dtype=jnp.float32)
    out_w = jax.block_until_ready(rmsnorm(x, w_rand, eps=1e-6))
    ref_w = x / rms * w_rand
    assert jnp.max(jnp.abs(out_w - ref_w)) < 1e-5

    # bf16 path (f32 accumulation; bf16 final scaling on v6e/v7x) - relaxed tol.
    xb = jax.random.normal(k3, (2, 9, 256), dtype=jnp.float32).astype(jnp.bfloat16)
    wb = (1.0 + 0.1 * jax.random.normal(k4, (256,), dtype=jnp.float32)).astype(jnp.bfloat16)
    out_b = jax.block_until_ready(rmsnorm(xb, wb, eps=1e-6))
    xbf = xb.astype(jnp.float32)
    ref_b = (xbf * jax.lax.rsqrt(jnp.mean(xbf * xbf, axis=-1, keepdims=True) + 1e-6)
             * wb.astype(jnp.float32))
    assert out_b.shape == xb.shape and out_b.dtype == jnp.bfloat16
    assert jnp.max(jnp.abs(out_b.astype(jnp.float32) - ref_b)) < 1e-1

    # Narrow-feature fallback path (d_model=32, like the original demo shape).
    x_small = jax.random.normal(k1, (2, 8, 32), dtype=jnp.float32)
    w_small = jnp.ones((32,), dtype=jnp.float32)
    out_small = jax.block_until_ready(rmsnorm(x_small, w_small, eps=1e-6))
    rms_s = jnp.sqrt(jnp.mean(x_small * x_small, axis=-1, keepdims=True) + 1e-6)
    ref_s = x_small / rms_s * w_small
    assert jnp.max(jnp.abs(out_small - ref_s)) < 1e-5

    print("KERNEL_OK")
</pallas_src>

<mosaic_0001>
module attributes {stable_mosaic.version = 11 : i64} {
  func.func @_rmsnorm_kernel(%arg0: i32, %arg1: memref<32x128xf32, #tpu.memory_space<vmem>>, %arg2: memref<1x128xf32, #tpu.memory_space<vmem>>, %arg3: memref<32x128xf32, #tpu.memory_space<vmem>>) attributes {dimension_semantics = [#tpu.dimension_semantics<parallel>], iteration_bounds = array<i64: 1>, scalar_prefetch = 0 : i64, scratch_operands = 0 : i64, tpu.core_type = #tpu.core_type<tc>, window_params = [{transform_indices = @transform_0, window_bounds = array<i64: 32, 128>}, {pipeline_mode = #tpu.pipeline_mode<synchronous>, transform_indices = @transform_1, window_bounds = array<i64: 1, 128>}, {transform_indices = @transform_2, window_bounds = array<i64: 32, 128>}]} {
    %c0 = arith.constant 0 : index
    %c0_0 = arith.constant 0 : index
    %0 = vector.load %arg1[%c0, %c0_0] : memref<32x128xf32, #tpu.memory_space<vmem>>, vector<32x128xf32>
    %1 = arith.mulf %0, %0 : vector<32x128xf32>
    %cst = arith.constant dense<0.000000e+00> : vector<32xf32>
    %2 = vector.multi_reduction <add>, %1, %cst [1] : vector<32x128xf32> to vector<32xf32>
    %3 = vector.shape_cast %2 : vector<32xf32> to vector<32x1xf32>
    %cst_1 = arith.constant 1.280000e+02 : f32
    %4 = vector.broadcast %cst_1 : f32 to vector<32x1xf32>
    %5 = arith.divf %3, %4 : vector<32x1xf32>
    %cst_2 = arith.constant 9.99999997E-7 : f32
    %6 = vector.broadcast %cst_2 : f32 to vector<32x1xf32>
    %7 = arith.addf %5, %6 : vector<32x1xf32>
    %8 = math.rsqrt %7 : vector<32x1xf32>
    %c0_3 = arith.constant 0 : index
    %c0_4 = arith.constant 0 : index
    %9 = vector.load %arg1[%c0_3, %c0_4] : memref<32x128xf32, #tpu.memory_space<vmem>>, vector<32x128xf32>
    %10 = vector.broadcast %8 : vector<32x1xf32> to vector<32x128xf32>
    %11 = arith.mulf %9, %10 : vector<32x128xf32>
    %c0_5 = arith.constant 0 : index
    %c0_6 = arith.constant 0 : index
    %12 = vector.load %arg2[%c0_5, %c0_6] : memref<1x128xf32, #tpu.memory_space<vmem>>, vector<1x128xf32>
    %13 = vector.broadcast %12 : vector<1x128xf32> to vector<32x128xf32>
    %14 = arith.mulf %11, %13 : vector<32x128xf32>
    %c0_7 = arith.constant 0 : index
    %c0_8 = arith.constant 0 : index
    %15 = vector.load %arg3[%c0_7, %c0_8] : memref<32x128xf32, #tpu.memory_space<vmem>>, vector<32x128xf32>
    tpu.vector_store %arg3[%c0_7, %c0_8], %14 {strides = array<i32>} : memref<32x128xf32, #tpu.memory_space<vmem>>, vector<32x128xf32>,
    return
  }
  func.func @transform_0(%arg0: i32) -> (i32, i32) {
    %c0_i32 = arith.constant 0 : i32
    %c0_i32_0 = arith.constant 0 : i32
    return %arg0, %c0_i32 : i32, i32
  }
  func.func @transform_1(%arg0: i32) -> (i32, i32) {
    %c0_i32 = arith.constant 0 : i32
    %c0_i32_0 = arith.constant 0 : i32
    %c0_i32_1 = arith.constant 0 : i32
    return %c0_i32, %c0_i32_0 : i32, i32
  }
  func.func @transform_2(%arg0: i32) -> (i32, i32) {
    %c0_i32 = arith.constant 0 : i32
    %c0_i32_0 = arith.constant 0 : i32
    return %arg0, %c0_i32 : i32, i32
  }
}

</mosaic_0001>

<bundles_post_ra>
// kernel: tpu_custom_call.1
= control target key start
LH: loop header
LB: loop body
LE: loop exit
PB: predicated region body
PF: predicated region fallthrough
CT: control target
= control target key end

     0   :  { %7 = vsyncpa [#allocation3], 0  ;;  %s295_s0 = inlined_call_operand.hbm [shape: f32[26,128], index: 0, kind: input, shape index: {}]   ;;  %s296_s1 = inlined_call_operand.hbm [shape: f32[1,128], index: 1, kind: input, shape index: {}]   ;;  %s297_s2 = inlined_call_operand.hbm [shape: f32[26,128], index: 2, kind: output, shape index: {}]  }
   0x1   :  { %8 = vsyncpa [#allocation6], 0 }
   0x2   :  { %9 = vsyncpa [#allocation4], 0  ;;  %s14_s11 = sshll.u32 %s295_s0, 4  ;;  %s244_s12 = smov [#allocation2]   ;;  %s15_s11 = int_to_ptr.hbm [resolvable:$true] %s14_s11 }
   0x3   :  { %s16_s13 = sshll.u32 %s244_s12, 4  ;;  %s28_s16 = sshll.u32 %s296_s1, 4  ;;  %s17_s13 = int_to_ptr.vmem [resolvable:$true] %s16_s13  ;;  %s29_s16 = int_to_ptr.hbm [resolvable:$true] %s28_s16 }
   0x4   :  { %s245_s17 = smov 128   ;;  %s246_s18 = smov 8  }
   0x5   :  { %22 = dma.hbm_to_vmem [thread:$0]  %s15_s11, 512, %s17_s13, [#allocation3], %s245_s17, %s245_s17, %s246_s18  }
   0x6   :  { %s247_s19 = smov [#allocation5]  }
   0x7   :  { %s30_s20 = sshll.u32 %s247_s19, 4  ;;  %s31_s20 = int_to_ptr.vmem [resolvable:$true] %s30_s20 }
   0x8   :  { %33 = dma.hbm_to_vmem [thread:$0]  %s29_s16, 16, %s31_s20, [#allocation6]  }
   0x9   :  { %238 = dma.done.wait [#allocation3], 512  }
   0xa   :  { %239 = vsyncadd [#allocation3], 4294966784 }
   0xb   :  { %240 = dma.done.wait [#allocation6], 16  }
   0xc   :  { %241 = vsyncadd [#allocation6], 4294967280  ;;  %v44_v0 = vld [vmem:[#allocation2 + $0x10] sm:$0xff]  ;;  %v274_v1 = vld [vmem:[#allocation2] sm:$0xff]  ;;  %v248_v8 = vmov 128.0   ;;  %s249_s0 = smov [#allocation7]  }
   0xd   :  { %v48_v2 = vmul.f32 %v44_v0, %v44_v0  ;;  %v46_v3 = vmul.f32 %v274_v1, %v274_v1  ;;  %v278_v4 = vld [vmem:[#allocation2 + $0x18] sm:$0xff]  ;;  %v280_v5 = vld [vmem:[#allocation2 + $0x8] sm:$0xff]  ;;  %156 = vrcp.f32 %v248_v8  ;;  %v155_v41 = vld [vmem:[#allocation5] ss:$0 sm:$0xff]  ;;  %s133_s1 = sshll.u32 %s249_s0, 4  ;;  %s135_s23 = sshll.u32 %s297_s2, 4  ;;  %s134_s1 = int_to_ptr.vmem [resolvable:$true] %s133_s1  ;;  %s136_s23 = int_to_ptr.hbm [resolvable:$true] %s135_s23 }
   0xe   :  { %v49_v6 = vmul.f32 %v278_v4, %v278_v4  ;;  %v47_v7 = vmul.f32 %v280_v5, %v280_v5 }
   0xf   :  { %54 = vadd.xlane.f32.xlu1 %v48_v2  ;;  %50 = vadd.xlane.f32.xlu0 %v46_v3 }
  0x13   :  { %v157_v9 = vpop.eup %156 }
  0x14   :  { %v59_v10 = vmul.f32 128.0, %v157_v9  ;;  %vm63_vm0 = vweird.f32 %v157_v9 }
  0x16   :  { %v60_v11 = vsub.f32 1.0, %v59_v10 }
  0x17   :  { %56 = vadd.xlane.f32.xlu1 %v49_v6  ;;  %52 = vadd.xlane.f32.xlu0 %v47_v7 }
  0x18   :  { %v61_v12 = vmul.f32 %v157_v9, %v60_v11 }
  0x1a   :  { %v62_v13 = vadd.f32 %v157_v9, %v61_v12 }
  0x1c   :  { %v64_v14 = vsel %vm63_vm0, %v157_v9, %v62_v13 }
  0x82   :  { %v55_v15 = vpop.xlane.xlu1 %54  ;;  %v51_v16 = vpop.xlane.xlu0 %50 }
  0x83   :  { %v67_v17 = vmul.f32 %v64_v14, %v55_v15  ;;  %v65_v18 = vmul.f32 %v64_v14, %v51_v16 }
  0x85   :  { %v71_v19 = vadd.f32 1e-06, %v67_v17  ;;  %v69_v20 = vadd.f32 1e-06, %v65_v18 }
  0x87   :  { %158 = vrsqrt.f32 %v71_v19  ;;  %vm99_vm3 = vweird.f32 %v71_v19  ;;  %vm79_vm5 = vweird.f32 %v69_v20 }
  0x88   :  { %160 = vrsqrt.f32 %v69_v20 }
  0x8a   :  { %v57_v21 = vpop.xlane.xlu1 %56  ;;  %v53_v22 = vpop.xlane.xlu0 %52 }
  0x8b   :  { %v68_v23 = vmul.f32 %v64_v14, %v57_v21  ;;  %v66_v24 = vmul.f32 %v64_v14, %v53_v22 }
  0x8d   :  { %v159_v25 = vpop.eup %158  ;;  %v72_v26 = vadd.f32 1e-06, %v68_v23  ;;  %v70_v27 = vadd.f32 1e-06, %v66_v24 }
  0x8e   :  { %v161_v28 = vpop.eup %160  ;;  %v94_v29 = vmul.f32 %v159_v25, %v71_v19  ;;  %vm100_vm1 = vweird.f32 %v159_v25 }
  0x8f   :  { %v74_v30 = vmul.f32 %v161_v28, %v69_v20  ;;  %162 = vrsqrt.f32 %v72_v26  ;;  %vm80_vm2 = vweird.f32 %v161_v28  ;;  %vm101_vm4 = vmor %vm99_vm3, %vm100_vm1  ;;  %vm109_vm9 = vweird.f32 %v72_v26 }
  0x90   :  { %v95_v31 = vmul.f32 %v159_v25, %v94_v29  ;;  %164 = vrsqrt.f32 %v70_v27  ;;  %vm81_vm6 = vmor %vm79_vm5, %vm80_vm2  ;;  %vm89_vm11 = vweird.f32 %v70_v27 }
  0x91   :  { %v75_v32 = vmul.f32 %v161_v28, %v74_v30 }
  0x92   :  { %v96_v33 = vmul.f32 0.5, %v95_v31 }
  0x93   :  { %v76_v34 = vmul.f32 0.5, %v75_v32 }
  0x94   :  { %v97_v35 = vsub.f32 1.5, %v96_v33 }
  0x95   :  { %v163_v36 = vpop.eup %162  ;;  %v77_v37 = vsub.f32 1.5, %v76_v34 }
  0x96   :  { %v165_v38 = vpop.eup %164  ;;  %v98_v39 = vmul.f32 %v159_v25, %v97_v35  ;;  %v104_v40 = vmul.f32 %v163_v36, %v72_v26  ;;  %vm110_vm7 = vweird.f32 %v163_v36 }
  0x97   :  { %v78_v42 = vmul.f32 %v161_v28, %v77_v37  ;;  %v84_v43 = vmul.f32 %v165_v38, %v70_v27  ;;  %vm90_vm8 = vweird.f32 %v165_v38  ;;  %vm111_vm10 = vmor %vm109_vm9, %vm110_vm7 }
  0x98   :  { %v102_v44 = vsel %vm101_vm4, %v159_v25, %v98_v39  ;;  %v105_v45 = vmul.f32 %v163_v36, %v104_v40  ;;  %vm91_vm12 = vmor %vm89_vm11, %vm90_vm8 }
  0x99   :  { %v115_v46 = vmul.f32 %v102_v44, %v44_v0  ;;  %v82_v47 = vsel %vm81_vm6, %v161_v28, %v78_v42  ;;  %v85_v48 = vmul.f32 %v165_v38, %v84_v43 }
  0x9a   :  { %v113_v49 = vmul.f32 %v82_v47, %v274_v1  ;;  %v106_v50 = vmul.f32 0.5, %v105_v45 }
  0x9b   :  { %v123_v51 = vmul.f32 %v155_v41, %v115_v46  ;;  %v86_v52 = vmul.f32 0.5, %v85_v48 }
  0x9c   :  { %v121_v53 = vmul.f32 %v155_v41, %v113_v49  ;;  %v107_v54 = vsub.f32 1.5, %v106_v50 }
  0x9d   :  { %127 = vst [vmem:[#allocation7 + $0x10] sm:$0xff] %v123_v51  ;;  %v87_v55 = vsub.f32 1.5, %v86_v52 }
  0x9e   :  { %125 = vst [vmem:[#allocation7] sm:$0xff] %v121_v53  ;;  %v108_v56 = vmul.f32 %v163_v36, %v107_v54 }
  0x9f   :  { %v88_v57 = vmul.f32 %v165_v38, %v87_v55 }
  0xa0   :  { %v112_v58 = vsel %vm111_vm10, %v163_v36, %v108_v56 }
  0xa1   :  { %v116_v59 = vmul.f32 %v112_v58, %v278_v4  ;;  %v92_v60 = vsel %vm91_vm12, %v165_v38, %v88_v57 }
  0xa2   :  { %v114_v61 = vmul.f32 %v92_v60, %v280_v5 }
  0xa3   :  { %v124_v62 = vmul.f32 %v155_v41, %v116_v59 }
  0xa4   :  { %v122_v63 = vmul.f32 %v155_v41, %v114_v61 }
  0xa5   :  { %128 = vst [vmem:[#allocation7 + $0x18] sm:$0xff] %v124_v62 }
  0xa6   :  { %126 = vst [vmem:[#allocation7 + $0x8] sm:$0xff] %v122_v63 }
  0xa7   :  { %141 = dma.vmem_to_hbm [thread:$0]  %s134_s1, 512, %s136_s23, [#allocation4], %s245_s17, %s245_s17, %s246_s18  }
  0xa8   :  { %242 = dma.done.wait [#allocation4], 512  }
  0xa9   :  { %243 = vsyncadd [#allocation4], 4294966784 }
  0xaa   :  { %146 = vsyncpa [#allocation3], 1 }
  0xab   :  { %147 = vsyncpa [#allocation6], 1 }
  0xac   :  { %148 = vsyncpa [#allocation4], 1 }

</bundles_post_ra>
